<compile_context>
chip_gen: v6e
topology: v6e:2x2x1
jax: 0.10.0
libtpu: 0.0.40
codegen_flags: <defaults>
</compile_context>

<pallas_src>
import functools

import numpy as np
import jax
import jax.numpy as jnp
from jax.experimental import pallas as pl
from jax.experimental.pallas import tpu as pltpu


# ----------------------------------------------------------------------------
# Row-tiling helpers
# ----------------------------------------------------------------------------
def _round_up(v, m):
    return ((v + m - 1) // m) * m


def _row_grid(rows, max_tile=512):
    """Pick a row tile (multiple of 32, bf16/f32 safe) and padded row count."""
    if rows >= max_tile:
        tile = max_tile
    else:
        tile = _round_up(max(rows, 1), 32)
    padded = _round_up(rows, tile)
    return tile, padded, padded // tile


def _pad_rows(x, padded):
    pad = padded - x.shape[0]
    if pad:
        x = jnp.concatenate([x, jnp.zeros((pad,) + x.shape[1:], x.dtype)], axis=0)
    return x


_PARALLEL = pltpu.CompilerParams(dimension_semantics=("parallel",))


# ----------------------------------------------------------------------------
# Pallas kernels
# ----------------------------------------------------------------------------
def _matmul_bias_kernel(x_ref, w_ref, b_ref, o_ref):
    # bf16 MXU operands, f32 accumulation.
    o_ref[...] = (jnp.dot(x_ref[...].astype(jnp.bfloat16), w_ref[...],
                          preferred_element_type=jnp.float32) + b_ref[...])


def matmul_bias(x, w, b, *, max_tile=512):
    """y = x @ w + b with w pre-transposed to (in, out) and pre-cast to bf16."""
    rows, K = x.shape
    Nout = w.shape[1]
    tile, padded, grid = _row_grid(rows, max_tile)
    xp = _pad_rows(x.astype(jnp.float32), padded)
    out = pl.pallas_call(
        _matmul_bias_kernel,
        grid=(grid,),
        out_shape=jax.ShapeDtypeStruct((padded, Nout), jnp.float32),
        in_specs=[pl.BlockSpec((tile, K), lambda i: (i, 0)),
                  pl.BlockSpec((K, Nout), lambda i: (0, 0)),
                  pl.BlockSpec((1, Nout), lambda i: (0, 0))],
        out_specs=pl.BlockSpec((tile, Nout), lambda i: (i, 0)),
        compiler_params=_PARALLEL,
        cost_estimate=pl.CostEstimate(
            flops=int(2 * padded * K * Nout),
            transcendentals=0,
            bytes_accessed=int(padded * K * 4 + K * Nout * 2 + padded * Nout * 4)),
    )(xp, w, b)
    return out[:rows]


def _edge_logits_kernel(xs_ref, xd_ref, ea_ref, we_ref, att_ref, o_ref):
    # fused: lin_edge matmul + (x_l[src] + x_r[dst] + e) + leaky_relu + per-head att dot
    m = (xs_ref[...].astype(jnp.float32) + xd_ref[...].astype(jnp.float32)
         + jnp.dot(ea_ref[...].astype(jnp.bfloat16), we_ref[...],
                   preferred_element_type=jnp.float32))
    m = jnp.where(m >= 0.0, m, 0.2 * m)          # leaky_relu, slope 0.2 (PyG default)
    # att_ref is a (heads*C, 8) padded block matrix so the per-head reduction is one matmul
    o_ref[...] = jnp.dot(m.astype(jnp.bfloat16), att_ref[...],
                         preferred_element_type=jnp.float32)


def edge_logits(xs, xd, ea, w_edge, att_mat, *, max_tile=1024):
    """Per-edge GATv2 attention logits; xs/xd are bf16 gathered x_l[src]/x_r[dst]."""
    E, HC = xs.shape
    ED = ea.shape[1]
    A = att_mat.shape[1]
    tile, padded, grid = _row_grid(E, max_tile)
    xs = _pad_rows(xs, padded)
    xd = _pad_rows(xd, padded)
    ea = _pad_rows(ea.astype(jnp.float32), padded)
    out = pl.pallas_call(
        _edge_logits_kernel,
        grid=(grid,),
        out_shape=jax.ShapeDtypeStruct((padded, A), jnp.float32),
        in_specs=[pl.BlockSpec((tile, HC), lambda i: (i, 0)),
                  pl.BlockSpec((tile, HC), lambda i: (i, 0)),
                  pl.BlockSpec((tile, ED), lambda i: (i, 0)),
                  pl.BlockSpec((ED, HC), lambda i: (0, 0)),
                  pl.BlockSpec((HC, A), lambda i: (0, 0))],
        out_specs=pl.BlockSpec((tile, A), lambda i: (i, 0)),
        compiler_params=_PARALLEL,
    )(xs, xd, ea, w_edge, att_mat)
    return out[:E]


def _gat_post0_kernel(a_ref, bias_ref, o_ref):
    # (already head-meaned) + bias + GELU (GAT layer 0, no residual / norm)
    o_ref[...] = jax.nn.gelu(a_ref[...] + bias_ref[...], approximate=False)


def _gat_post_res_kernel(a_ref, bias_ref, res_ref, g_ref, b_ref, o_ref):
    # (head-meaned) + bias + residual + LayerNorm + GELU (EnhancedGATBlock + F.gelu)
    y = a_ref[...] + bias_ref[...] + res_ref[...]
    mu = jnp.mean(y, axis=-1, keepdims=True)
    var = jnp.mean(jnp.square(y - mu), axis=-1, keepdims=True)
    y = (y - mu) * jax.lax.rsqrt(var + 1e-5) * g_ref[...] + b_ref[...]
    o_ref[...] = jax.nn.gelu(y, approximate=False)


def gat_post0(agg, bias, *, max_tile=512):
    rows, C = agg.shape
    tile, padded, grid = _row_grid(rows, max_tile)
    out = pl.pallas_call(
        _gat_post0_kernel,
        grid=(grid,),
        out_shape=jax.ShapeDtypeStruct((padded, C), jnp.float32),
        in_specs=[pl.BlockSpec((tile, C), lambda i: (i, 0)),
                  pl.BlockSpec((1, C), lambda i: (0, 0))],
        out_specs=pl.BlockSpec((tile, C), lambda i: (i, 0)),
        compiler_params=_PARALLEL,
    )(_pad_rows(agg, padded), bias)
    return out[:rows]


def gat_post_res(agg, bias, res, g, b, *, max_tile=512):
    rows, C = agg.shape
    tile, padded, grid = _row_grid(rows, max_tile)
    out = pl.pallas_call(
        _gat_post_res_kernel,
        grid=(grid,),
        out_shape=jax.ShapeDtypeStruct((padded, C), jnp.float32),
        in_specs=[pl.BlockSpec((tile, C), lambda i: (i, 0)),
                  pl.BlockSpec((1, C), lambda i: (0, 0)),
                  pl.BlockSpec((tile, C), lambda i: (i, 0)),
                  pl.BlockSpec((1, C), lambda i: (0, 0)),
                  pl.BlockSpec((1, C), lambda i: (0, 0))],
        out_specs=pl.BlockSpec((tile, C), lambda i: (i, 0)),
        compiler_params=_PARALLEL,
    )(_pad_rows(agg, padded), bias, _pad_rows(res, padded), g, b)
    return out[:rows]


def _bilstm2_pool_kernel(x_ref, m_ref,
                         wih0_ref, whh0_ref, b0_ref,
                         wih1f_ref, wih1b_ref, whh1_ref, b1_ref,
                         out_ref, xp_sc, y0f_sc, y0b_sc, *, T, TB, H):
    """2-layer bidirectional LSTM + masked-mean pooling for one batch tile.

    x_ref  : (T, TB, H) time-major batch tile
    m_ref  : (T, TB, 1) float mask
    Gate column layout (built in _prep_lstm): [i_f,i_b,f_f,f_b,o_f,o_b,g_f,g_b], each H
    wide, so the fused fwd/bwd cell applies ONE sigmoid over 6H lanes and ONE tanh over
    2H lanes; W_hh is a block-diagonal (2H, 8H) so both directions share one MXU push.
    """
    G2 = 2 * H
    col = jax.lax.broadcasted_iota(jnp.int32, (1, 8 * H), 1)
    fwd_mask = (col // H) % 2 == 0          # even H-blocks carry forward-direction gates

    def cell(tf, tb, h_cat, c_cat, whh_ref):
        pre = jnp.where(fwd_mask,
                        xp_sc[pl.ds(tf * TB, TB), :],
                        xp_sc[pl.ds(tb * TB, TB), :])
        g = pre + jnp.dot(h_cat, whh_ref[...], preferred_element_type=jnp.float32)  # f32
        sig = jax.nn.sigmoid(g[:, 0:6 * H])
        gat = jnp.tanh(g[:, 6 * H:8 * H])
        i_c = sig[:, 0:G2]
        f_c = sig[:, G2:2 * G2]
        o_c = sig[:, 2 * G2:3 * G2]
        c_new = f_c * c_cat + i_c * gat
        h_new = o_c * jnp.tanh(c_new)
        return h_new, c_new

    # ---- layer 0: hoisted per-timestep input projections (bf16 MXU, f32 accumulate) ----
    for t in range(T):
        xp_sc[pl.ds(t * TB, TB), :] = (
            jnp.dot(x_ref[t].astype(jnp.bfloat16), wih0_ref[...],
                    preferred_element_type=jnp.float32) + b0_ref[...])

    zero = jnp.zeros((TB, G2), jnp.float32)
    h_cat, c_cat = zero, zero
    for i in range(T):                       # fully unrolled; only h@W_hh stays serial
        tf, tb = i, T - 1 - i
        h_cat, c_cat = cell(tf, tb, h_cat, c_cat, whh0_ref)
        y0f_sc[pl.ds(tf * TB, TB), :] = h_cat[:, 0:H]
        y0b_sc[pl.ds(tb * TB, TB), :] = h_cat[:, H:G2]

    # ---- layer 1: single hoisted input projection over the whole sequence -------------
    xp_sc[...] = (
        jnp.dot(y0f_sc[...].astype(jnp.bfloat16), wih1f_ref[...],
                preferred_element_type=jnp.float32)
        + jnp.dot(y0b_sc[...].astype(jnp.bfloat16), wih1b_ref[...],
                  preferred_element_type=jnp.float32)
        + b1_ref[...])

    h_cat, c_cat = zero, zero
    acc_f = jnp.zeros((TB, H), jnp.float32)
    acc_b = jnp.zeros((TB, H), jnp.float32)
    cnt = jnp.zeros((TB, 1), jnp.float32)
    for i in range(T):
        tf, tb = i, T - 1 - i
        h_cat, c_cat = cell(tf, tb, h_cat, c_cat, whh1_ref)
        acc_f = acc_f + h_cat[:, 0:H] * m_ref[tf]    # masked-mean fused: no (T,B,2H) writeback
        acc_b = acc_b + h_cat[:, H:G2] * m_ref[tb]
        cnt = cnt + m_ref[tf]

    denom = jnp.maximum(cnt, 1e-6)                   # matches torch .clamp(min=1e-6)
    out_ref[...] = jnp.concatenate([acc_f, acc_b], axis=-1) / denom


def bilstm_pool(lp, hist_dense, cur_dense, hist_mask, cur_mask, hidden, *, max_tile=256):
    """Shared 2-layer BiLSTM + masked-mean pooling over hist+cur sequences, batch-tiled."""
    T = hist_dense.shape[1]
    H = hidden
    x = jnp.concatenate([hist_dense, cur_dense], axis=0)     # (2B, T, H)
    m = jnp.concatenate([hist_mask, cur_mask], axis=0)       # (2B, T)
    B2 = x.shape[0]
    tile_b, bpp, grid = _row_grid(B2, max_tile)
    x = _pad_rows(x, bpp)
    m = _pad_rows(m, bpp)
    x3 = jnp.transpose(x, (1, 0, 2))                          # (T, BPP, H)
    m3 = jnp.transpose(m, (1, 0))[..., None]                  # (T, BPP, 1)

    pooled = pl.pallas_call(
        functools.partial(_bilstm2_pool_kernel, T=T, TB=tile_b, H=H),
        grid=(grid,),
        out_shape=jax.ShapeDtypeStruct((bpp, 2 * H), jnp.float32),
        in_specs=[pl.BlockSpec((T, tile_b, H), lambda i: (0, i, 0)),
                  pl.BlockSpec((T, tile_b, 1), lambda i: (0, i, 0)),
                  pl.BlockSpec((H, 8 * H), lambda i: (0, 0)),
                  pl.BlockSpec((2 * H, 8 * H), lambda i: (0, 0)),
                  pl.BlockSpec((1, 8 * H), lambda i: (0, 0)),
                  pl.BlockSpec((H, 8 * H), lambda i: (0, 0)),
                  pl.BlockSpec((H, 8 * H), lambda i: (0, 0)),
                  pl.BlockSpec((2 * H, 8 * H), lambda i: (0, 0)),
                  pl.BlockSpec((1, 8 * H), lambda i: (0, 0))],
        out_specs=pl.BlockSpec((tile_b, 2 * H), lambda i: (i, 0)),
        scratch_shapes=[pltpu.VMEM((T * tile_b, 8 * H), jnp.float32),   # gate projections
                        pltpu.VMEM((T * tile_b, H), jnp.float32),       # layer-0 fwd out
                        pltpu.VMEM((T * tile_b, H), jnp.float32)],      # layer-0 bwd out
        compiler_params=_PARALLEL,
        cost_estimate=pl.CostEstimate(
            flops=int(2 * T * bpp * 8 * H * 5 * H),
            transcendentals=int(T * bpp * 20 * H),
            bytes_accessed=int(x3.size * 4 + m3.size * 4 + bpp * 2 * H * 4)),
    )(x3, m3, lp['wih0'], lp['whh0'], lp['b0'],
      lp['wih1f'], lp['wih1b'], lp['whh1'], lp['b1'])

    B = B2 // 2
    return pooled[:B], pooled[B:B2]            # hist_plays, cur_plays


def _mha_kernel(q_ref, kv_ref, wq_ref, bq_ref, wkv_ref, bkv_ref, wo_ref, bo_ref,
                o_ref, attn_sc, *, num_heads, scale):
    E = q_ref.shape[-1]
    dh = E // num_heads
    q = (jnp.dot(q_ref[...].astype(jnp.bfloat16), wq_ref[...],
                 preferred_element_type=jnp.float32) + bq_ref[...])
    kv = (jnp.dot(kv_ref[...].astype(jnp.bfloat16), wkv_ref[...],
                  preferred_element_type=jnp.float32) + bkv_ref[...])
    k = kv[:, 0:E]
    v = kv[:, E:2 * E]
    # TODO(synk): flash-style kv tiling (online softmax) once Lkv grows beyond VMEM budget.
    for h in range(num_heads):
        sl = slice(h * dh, (h + 1) * dh)
        s = jax.lax.dot_general(q[:, sl].astype(jnp.bfloat16),
                                k[:, sl].astype(jnp.bfloat16),
                                (((1,), (1,)), ((), ())),
                                preferred_element_type=jnp.float32) * scale
        p = jax.nn.softmax(s, axis=-1)
        attn_sc[:, sl] = jnp.dot(p.astype(jnp.bfloat16), v[:, sl].astype(jnp.bfloat16),
                                 preferred_element_type=jnp.float32)
    o_ref[...] = (jnp.dot(attn_sc[...].astype(jnp.bfloat16), wo_ref[...],
                          preferred_element_type=jnp.float32) + bo_ref[...])


def mha(mp, q_in, kv_in, num_heads, *, max_tile=512):
    """nn.MultiheadAttention on unbatched (L, E) inputs; fused, query-row tiled."""
    E = q_in.shape[-1]
    dh = E // num_heads
    Lq = q_in.shape[0]
    Lkv = kv_in.shape[0]
    tile, padded, grid = _row_grid(Lq, max_tile)
    qp = _pad_rows(q_in.astype(jnp.float32), padded)
    kv = kv_in.astype(jnp.float32)
    out = pl.pallas_call(
        functools.partial(_mha_kernel, num_heads=num_heads,
                          scale=1.0 / float(np.sqrt(dh))),
        grid=(grid,),
        out_shape=jax.ShapeDtypeStruct((padded, E), jnp.float32),
        in_specs=[pl.BlockSpec((tile, E), lambda i: (i, 0)),
                  pl.BlockSpec((Lkv, E), lambda i: (0, 0)),
                  pl.BlockSpec((E, E), lambda i: (0, 0)),
                  pl.BlockSpec((1, E), lambda i: (0, 0)),
                  pl.BlockSpec((E, 2 * E), lambda i: (0, 0)),
                  pl.BlockSpec((1, 2 * E), lambda i: (0, 0)),
                  pl.BlockSpec((E, E), lambda i: (0, 0)),
                  pl.BlockSpec((1, E), lambda i: (0, 0))],
        out_specs=pl.BlockSpec((tile, E), lambda i: (i, 0)),
        scratch_shapes=[pltpu.VMEM((tile, E), jnp.float32)],
        compiler_params=_PARALLEL,
    )(qp, kv, mp['wq'], mp['bq'], mp['wkv'], mp['bkv'], mp['wo'], mp['bo'])
    return out[:Lq]


def _mlp_kernel(x_ref, w0, b0, g0, be0, w1, b1, g1, be1, w2, b2, g2, be2, w3, b3, o_ref):
    def ln(v, g, b):
        mu = jnp.mean(v, axis=-1, keepdims=True)
        var = jnp.mean(jnp.square(v - mu), axis=-1, keepdims=True)
        return (v - mu) * jax.lax.rsqrt(var + 1e-5) * g[...] + b[...]

    h = jnp.dot(x_ref[...].astype(jnp.bfloat16), w0[...],
                preferred_element_type=jnp.float32) + b0[...]
    h = jax.nn.gelu(ln(h, g0, be0), approximate=False)         # Linear -> LN -> GELU
    h = jnp.dot(h.astype(jnp.bfloat16), w1[...],
                preferred_element_type=jnp.float32) + b1[...]
    h = jax.nn.gelu(ln(h, g1, be1), approximate=False)         # Linear -> LN -> GELU
    h = jnp.dot(h, w2[...], preferred_element_type=jnp.float32) + b2[...]
    h = ln(jax.nn.gelu(h, approximate=False), g2, be2)         # Linear -> GELU -> LN
    o_ref[...] = jnp.dot(h, w3[...], preferred_element_type=jnp.float32) + b3[...]


def mlp_forward(mp, x, *, max_tile=512):
    rows, K = x.shape
    Nout = mp['w3'].shape[1]
    tile, padded, grid = _row_grid(rows, max_tile)
    xp = _pad_rows(x.astype(jnp.float32), padded)

    def full(a):
        return pl.BlockSpec(a.shape, lambda i: (0, 0))

    out = pl.pallas_call(
        _mlp_kernel,
        grid=(grid,),
        out_shape=jax.ShapeDtypeStruct((padded, Nout), jnp.float32),
        in_specs=[pl.BlockSpec((tile, K), lambda i: (i, 0)),
                  full(mp['w0']), full(mp['b0']), full(mp['g0']), full(mp['be0']),
                  full(mp['w1']), full(mp['b1']), full(mp['g1']), full(mp['be1']),
                  full(mp['w2']), full(mp['b2']), full(mp['g2']), full(mp['be2']),
                  full(mp['w3']), full(mp['b3'])],
        out_specs=pl.BlockSpec((tile, Nout), lambda i: (i, 0)),
        compiler_params=_PARALLEL,
    )(xp, mp['w0'], mp['b0'], mp['g0'], mp['be0'],
      mp['w1'], mp['b1'], mp['g1'], mp['be1'],
      mp['w2'], mp['b2'], mp['g2'], mp['be2'], mp['w3'], mp['b3'])
    return out[:rows]


# ----------------------------------------------------------------------------
# Model components (kernels + irregular glue)
# ----------------------------------------------------------------------------
def gat_layer(gp, x, src, dst, e_attr, heads, out_ch, residual=None, ln=None):
    """GATv2Conv(concat=False) [+ residual + LayerNorm] + GELU."""
    N = x.shape[0]
    HC = heads * out_ch

    # fused [lin_l | lin_r] projection (lane-dense 128-wide output)
    xlr = matmul_bias(x, gp['w_lr'], gp['b_lr'])
    x_l_b = xlr[:, :HC].astype(jnp.bfloat16)
    x_r_b = xlr[:, HC:].astype(jnp.bfloat16)

    # TODO(synk): move these (E, HC) row gathers in-kernel (scalar-prefetched src/dst +
    # in-VMEM gather) once an edge-tiled PrefetchScalarGridSpec is added; bf16 halves
    # their HBM traffic in the meantime.
    xs_g = jnp.take(x_l_b, src, axis=0)
    xd_g = jnp.take(x_r_b, dst, axis=0)

    logits = edge_logits(xs_g, xd_g, e_attr, gp['w_edge'], gp['att_mat'])[:, :heads]

    # TODO(synk): segment softmax / scatter aggregation over edges stays in JAX glue.
    m = jax.ops.segment_max(logits, dst, num_segments=N)
    alpha = jnp.exp(logits - m[dst])
    alpha = alpha / jax.ops.segment_sum(alpha, dst, num_segments=N)[dst]
    msg = xs_g.astype(jnp.float32).reshape(-1, heads, out_ch)
    agg = jax.ops.segment_sum(alpha[:, :, None] * msg, dst, num_segments=N)
    agg_mean = jnp.mean(agg, axis=1)                 # head-mean in glue -> (N, out_ch)

    if residual is None:
        return gat_post0(agg_mean, gp['bias'])
    return gat_post_res(agg_mean, gp['bias'], residual, ln[0], ln[1])


def to_dense_batch(feats, batch_np, batch_size, max_nodes):
    """Equivalent of torch_geometric.utils.to_dense_batch (batch assumed sorted)."""
    f = feats.shape[-1]
    n = batch_np.shape[0]
    pos = np.zeros(n, np.int32)
    counts = np.zeros(batch_size, np.int32)
    for i, g in enumerate(batch_np):
        pos[i] = counts[g]
        counts[g] += 1
    dense = jnp.zeros((batch_size, max_nodes, f), jnp.float32)
    dense = dense.at[jnp.asarray(batch_np), jnp.asarray(pos)].set(feats.astype(jnp.float32))
    mask = np.zeros((batch_size, max_nodes), np.float32)
    mask[batch_np, pos] = 1.0
    return dense, jnp.asarray(mask)


# ----------------------------------------------------------------------------
# One-time parameter preparation (transpose / concat / reorder / cast — once)
# ----------------------------------------------------------------------------
def _prep_gat(g, heads, hidden):
    w_lr = jnp.concatenate([jnp.asarray(g['lin_l_w'], jnp.float32).T,
                            jnp.asarray(g['lin_r_w'], jnp.float32).T], axis=1)
    b_lr = jnp.concatenate([jnp.asarray(g['lin_l_b'], jnp.float32),
                            jnp.asarray(g['lin_r_b'], jnp.float32)])[None, :]
    w_edge = jnp.asarray(g['lin_edge_w'], jnp.float32).T
    att = jnp.asarray(g['att'], jnp.float32)
    A = max(8, _round_up(heads, 8))                  # lane-padded attention columns
    att_mat = jnp.zeros((heads * hidden, A), jnp.float32)
    for h in range(heads):
        att_mat = att_mat.at[h * hidden:(h + 1) * hidden, h].set(att[h])
    bias = jnp.asarray(g['bias'], jnp.float32)[None, :]
    return dict(w_lr=w_lr.astype(jnp.bfloat16), b_lr=b_lr,
                w_edge=w_edge.astype(jnp.bfloat16),
                att_mat=att_mat.astype(jnp.bfloat16), bias=bias)


def _prep_lstm(p, hidden):
    H = hidden
    t = lambda w: jnp.asarray(w, jnp.float32).T
    # torch gate order along 4H is [i, f, g, o]; target per-gate block order is
    # [i, f, o, g] with directions interleaved -> [i_f,i_b,f_f,f_b,o_f,o_b,g_f,g_b].
    GATE_ORDER = (0, 1, 3, 2)

    def interleave_w(wf_t, wr_t):
        blocks = []
        for g in GATE_ORDER:
            blocks.append(wf_t[:, g * H:(g + 1) * H])
            blocks.append(wr_t[:, g * H:(g + 1) * H])
        return jnp.concatenate(blocks, axis=1)                         # (Din, 8H)

    def blockdiag_hh(whh_f, whh_r):
        wf_t, wr_t = t(whh_f), t(whh_r)
        z = jnp.zeros((H, H), jnp.float32)
        top, bot = [], []
        for g in GATE_ORDER:
            top += [wf_t[:, g * H:(g + 1) * H], z]
            bot += [z, wr_t[:, g * H:(g + 1) * H]]
        return jnp.concatenate([jnp.concatenate(top, axis=1),
                                jnp.concatenate(bot, axis=1)], axis=0)  # (2H, 8H) f32

    def bias(l):
        bf = jnp.asarray(l['b_ih_f'], jnp.float32) + jnp.asarray(l['b_hh_f'], jnp.float32)
        br = jnp.asarray(l['b_ih_r'], jnp.float32) + jnp.asarray(l['b_hh_r'], jnp.float32)
        blocks = []
        for g in GATE_ORDER:
            blocks.append(bf[g * H:(g + 1) * H])
            blocks.append(br[g * H:(g + 1) * H])
        return jnp.concatenate(blocks)[None, :]

    l0, l1 = p['l0'], p['l1']
    wih1f_t = t(l1['w_ih_f'])                                           # (2H, 4H)
    wih1r_t = t(l1['w_ih_r'])
    return dict(
        wih0=interleave_w(t(l0['w_ih_f']), t(l0['w_ih_r'])).astype(jnp.bfloat16),  # (H,8H)
        whh0=blockdiag_hh(l0['w_hh_f'], l0['w_hh_r']),                              # f32
        b0=bias(l0),
        wih1f=interleave_w(wih1f_t[:H], wih1r_t[:H]).astype(jnp.bfloat16),  # acts on y0 fwd half
        wih1b=interleave_w(wih1f_t[H:], wih1r_t[H:]).astype(jnp.bfloat16),  # acts on y0 bwd half
        whh1=blockdiag_hh(l1['w_hh_f'], l1['w_hh_r']),
        b1=bias(l1),
    )


def _prep_mha(p, E):
    w = jnp.asarray(p['in_proj_w'], jnp.float32)
    b = jnp.asarray(p['in_proj_b'], jnp.float32)
    return dict(wq=w[:E].T.astype(jnp.bfloat16), bq=b[:E][None, :],
                wkv=w[E:].T.astype(jnp.bfloat16), bkv=b[E:][None, :],
                wo=jnp.asarray(p['out_proj_w'], jnp.float32).T.astype(jnp.bfloat16),
                bo=jnp.asarray(p['out_proj_b'], jnp.float32)[None, :])


def _prep_mlp(m):
    t = lambda w: jnp.asarray(w, jnp.float32).T
    r = lambda v: jnp.asarray(v, jnp.float32)[None, :]
    return dict(w0=t(m['w0']).astype(jnp.bfloat16), b0=r(m['b0']),
                g0=r(m['ln0_g']), be0=r(m['ln0_b']),
                w1=t(m['w1']).astype(jnp.bfloat16), b1=r(m['b1']),
                g1=r(m['ln1_g']), be1=r(m['ln1_b']),
                w2=t(m['w2']), b2=r(m['b2']), g2=r(m['ln2_g']), be2=r(m['ln2_b']),
                w3=t(m['w3']), b3=r(m['b3']))


def prepare_params(p, *, hidden, heads):
    q = dict(
        position_embedding=jnp.asarray(p['position_embedding'], jnp.float32),
        down_emb=jnp.asarray(p['down_emb'], jnp.float32),
        quarter_emb=jnp.asarray(p['quarter_emb'], jnp.float32),
        team_emb=jnp.asarray(p['team_emb'], jnp.float32),
        player_emb=jnp.asarray(p['player_emb'], jnp.float32),
        gnn0=_prep_gat(p['gnn0'], heads, hidden),
        lstm=_prep_lstm(p['lstm'], hidden),
        mha=_prep_mha(p['mha'], 2 * hidden),
        mlp=_prep_mlp(p['mlp']),
    )
    for name in ('gnn1', 'gnn2'):
        q[name] = dict(gat=_prep_gat(p[name]['gat'], heads, hidden),
                       ln_g=jnp.asarray(p[name]['ln_g'], jnp.float32)[None, :],
                       ln_b=jnp.asarray(p[name]['ln_b'], jnp.float32)[None, :])
    return q


# ----------------------------------------------------------------------------
# Full PlayGNN forward
# ----------------------------------------------------------------------------
def play_gnn_forward(pp, data, *, hidden=32, heads=2, max_per_graph=16):
    batch_np = np.asarray(data['batch'])
    batch_size = int(batch_np.max()) + 1

    x = jnp.asarray(data['x'], jnp.float32)
    pos_idx = x[:, 0].astype(jnp.int32)
    raw = x[:, 1:5]
    pos_e = jnp.take(pp['position_embedding'], pos_idx, axis=0)
    down_e = jnp.take(pp['down_emb'], jnp.asarray(data['down']) - 1, axis=0)
    quarter_e = jnp.take(pp['quarter_emb'], jnp.asarray(data['quarter']) - 1, axis=0)
    team_e = jnp.take(pp['team_emb'], jnp.asarray(data['offense_team']), axis=0)
    player_e = jnp.take(pp['player_emb'], jnp.asarray(data['player_ids']), axis=0)
    numeric = jnp.stack([jnp.asarray(data['game_clock'], jnp.float32),
                         jnp.asarray(data['yardline'], jnp.float32),
                         jnp.asarray(data['yards_to_go'], jnp.float32),
                         jnp.asarray(data['offense_score'], jnp.float32),
                         jnp.asarray(data['defense_score'], jnp.float32)], axis=1)
    node = jnp.concatenate([pos_e, raw, down_e, quarter_e, team_e, numeric, player_e], axis=1)

    edge_index = jnp.asarray(data['edge_index'], jnp.int32)
    edge_feat = jnp.asarray(data['edge_attr'], jnp.float32)[:, 0:3]
    N = node.shape[0]
    src0, dst0 = edge_index[0], edge_index[1]

    # add_self_loops with fill_value='mean' — identical for all 3 layers, computed once
    deg = jax.ops.segment_sum(jnp.ones(src0.shape[0], jnp.float32), dst0, num_segments=N)
    loop_attr = (jax.ops.segment_sum(edge_feat, dst0, num_segments=N)
                 / jnp.maximum(deg, 1.0)[:, None])
    ar = jnp.arange(N, dtype=src0.dtype)
    src = jnp.concatenate([src0, ar])
    dst = jnp.concatenate([dst0, ar])
    e_attr = jnp.concatenate([edge_feat, loop_attr], axis=0)

    # GNN stack: layer 0 bare GATv2Conv + GELU, layers 1..2 residual + LN + GELU blocks
    h = gat_layer(pp['gnn0'], node, src, dst, e_attr, heads, hidden)
    for name in ('gnn1', 'gnn2'):
        blk = pp[name]
        h = gat_layer(blk['gat'], h, src, dst, e_attr, heads, hidden,
                      residual=h, ln=(blk['ln_g'], blk['ln_b']))

    plays_elapsed = np.asarray(data['plays_elapsed'])
    hist_idx = np.where(plays_elapsed > 0)[0]
    cur_idx = np.where(plays_elapsed == 0)[0]

    hist_dense, hist_mask = to_dense_batch(h[hist_idx], batch_np[hist_idx],
                                           batch_size, max_per_graph)
    cur_dense, cur_mask = to_dense_batch(h[cur_idx], batch_np[cur_idx],
                                         batch_size, max_per_graph)

    # single fused, batch-tiled kernel: shared 2-layer BiLSTM + masked-mean pooling
    hist_plays, cur_plays = bilstm_pool(pp['lstm'], hist_dense, cur_dense,
                                        hist_mask, cur_mask, hidden)

    attended = mha(pp['mha'], cur_plays, hist_plays, num_heads=2)
    final_rep = jnp.concatenate([cur_plays, attended], axis=-1)

    eligible = np.asarray(data['eligible_mask']).astype(bool) & (plays_elapsed == 0)
    el_idx = np.where(eligible)[0]
    eligible_nodes = h[el_idx]
    eligible_batch_idx = batch_np[el_idx]
    play_context = final_rep[jnp.asarray(eligible_batch_idx)]
    combined = jnp.concatenate([eligible_nodes, play_context], axis=1)

    route_predictions = mlp_forward(pp['mlp'], combined)
    return {'route_predictions': route_predictions,
            'eligible_batch_idx': jnp.asarray(eligible_batch_idx)}


# ----------------------------------------------------------------------------
# Deterministic parameter init (synthetic weights, torch layout / conventions)
# ----------------------------------------------------------------------------
def init_params(key, *, num_positions, hidden, num_route_classes, heads=2):
    keys = jax.random.split(key, 64)
    ctr = [0]

    def nrm(shape, scale=0.05):
        k = keys[ctr[0]]
        ctr[0] += 1
        return (scale * jax.random.normal(k, shape)).astype(jnp.float32)

    zeros = lambda s: jnp.zeros(s, jnp.float32)
    ones = lambda s: jnp.ones(s, jnp.float32)

    p = {
        'position_embedding': nrm((num_positions, 4)),
        'down_emb': nrm((4, 2)),
        'quarter_emb': nrm((4, 2)),
        'team_emb': nrm((32, 8)),
        'player_emb': nrm((1000, 16)),
    }
    emb_dims = 4 + 2 + 2 + 8 + 16
    in0 = 5 + 4 + emb_dims                       # = 41

    def gat_params(in_dim):
        return dict(
            lin_l_w=nrm((heads * hidden, in_dim)), lin_l_b=zeros((heads * hidden,)),
            lin_r_w=nrm((heads * hidden, in_dim)), lin_r_b=zeros((heads * hidden,)),
            lin_edge_w=nrm((heads * hidden, 3)),
            att=nrm((heads, hidden)),
            bias=zeros((hidden,)),
        )

    p['gnn0'] = gat_params(in0)
    p['gnn1'] = dict(gat=gat_params(hidden), ln_g=ones((hidden,)), ln_b=zeros((hidden,)))
    p['gnn2'] = dict(gat=gat_params(hidden), ln_g=ones((hidden,)), ln_b=zeros((hidden,)))

    def lstm_layer(in_dim):
        return dict(
            w_ih_f=nrm((4 * hidden, in_dim)), w_hh_f=nrm((4 * hidden, hidden)),
            b_ih_f=zeros((4 * hidden,)), b_hh_f=zeros((4 * hidden,)),
            w_ih_r=nrm((4 * hidden, in_dim)), w_hh_r=nrm((4 * hidden, hidden)),
            b_ih_r=zeros((4 * hidden,)), b_hh_r=zeros((4 * hidden,)),
        )

    p['lstm'] = dict(l0=lstm_layer(hidden), l1=lstm_layer(2 * hidden))

    E = 2 * hidden
    p['mha'] = dict(in_proj_w=nrm((3 * E, E)), in_proj_b=zeros((3 * E,)),
                    out_proj_w=nrm((E, E)), out_proj_b=zeros((E,)))

    p['mlp'] = dict(
        w0=nrm((2 * hidden, 5 * hidden)), b0=zeros((2 * hidden,)),
        ln0_g=ones((2 * hidden,)), ln0_b=zeros((2 * hidden,)),
        w1=nrm((hidden, 2 * hidden)), b1=zeros((hidden,)),
        ln1_g=ones((hidden,)), ln1_b=zeros((hidden,)),
        w2=nrm((16, hidden)), b2=zeros((16,)),
        ln2_g=ones((16,)), ln2_b=zeros((16,)),
        w3=nrm((num_route_classes, 16)), b3=zeros((num_route_classes,)),
    )
    return p


# ----------------------------------------------------------------------------
# Demo
# ----------------------------------------------------------------------------
if __name__ == "__main__":
    hidden = 32
    num_positions = 12
    num_route_classes = 10
    heads = 2

    raw_params = init_params(jax.random.PRNGKey(42), num_positions=num_positions,
                             hidden=hidden, num_route_classes=num_route_classes, heads=heads)
    params = prepare_params(raw_params, hidden=hidden, heads=heads)

    # Synthetic mini-batch: 2 graphs, each with 6 historical + 5 current-play nodes.
    key = jax.random.PRNGKey(0)
    ks = jax.random.split(key, 12)
    B = 2
    nodes_per_graph = 11
    N = B * nodes_per_graph
    batch = np.repeat(np.arange(B), nodes_per_graph)
    plays_elapsed = np.tile(np.array([1, 1, 1, 1, 1, 1, 0, 0, 0, 0, 0]), B)
    eligible_mask = np.tile(np.array([0, 0, 1, 0, 1, 1, 1, 1, 1, 0, 0]), B)

    pos_ids = jax.random.randint(ks[0], (N,), 0, num_positions)
    raw_feats = jax.random.normal(ks[1], (N, 4))
    data_x = jnp.concatenate([pos_ids[:, None].astype(jnp.float32), raw_feats], axis=1)

    # fully-connected directed edges within each graph (no self loops in input)
    src_l, dst_l = [], []
    for g in range(B):
        idx = list(range(g * nodes_per_graph, (g + 1) * nodes_per_graph))
        for i in idx:
            for j in idx:
                if i != j:
                    src_l.append(i)
                    dst_l.append(j)
    edge_index = np.stack([np.asarray(src_l), np.asarray(dst_l)])
    edge_attr = jax.random.normal(ks[2], (edge_index.shape[1], 4))

    data = dict(
        x=data_x,                                      # (N, 5): [position_idx, 4 raw feats]
        batch=batch,
        edge_index=edge_index,                         # (2, E)
        edge_attr=edge_attr,                           # (E, 4) -> first 3 cols used
        down=np.asarray(jax.random.randint(ks[3], (N,), 1, 5)),
        quarter=np.asarray(jax.random.randint(ks[4], (N,), 1, 5)),
        offense_team=np.asarray(jax.random.randint(ks[5], (N,), 0, 32)),
        player_ids=np.asarray(jax.random.randint(ks[6], (N,), 0, 1000)),
        game_clock=jax.random.uniform(ks[7], (N,)),
        yardline=jax.random.uniform(ks[8], (N,)) * 100.0,
        yards_to_go=jax.random.uniform(ks[9], (N,)) * 10.0,
        offense_score=jax.random.uniform(ks[10], (N,)) * 30.0,
        defense_score=jax.random.uniform(ks[11], (N,)) * 30.0,
        plays_elapsed=plays_elapsed,
        eligible_mask=eligible_mask,
    )

    out = play_gnn_forward(params, data, hidden=hidden, heads=heads)
    jax.block_until_ready(out['route_predictions'])
    n_eligible = int((eligible_mask.astype(bool) & (plays_elapsed == 0)).sum())
    assert out['route_predictions'].shape == (n_eligible, num_route_classes)
    assert bool(jnp.all(jnp.isfinite(out['route_predictions'])))
    print("KERNEL_OK")
</pallas_src>

<mosaic_0001>
module attributes {stable_mosaic.version = 11 : i64} {
  func.func @_matmul_bias_kernel(%arg0: i32, %arg1: memref<32x41xf32, #tpu.memory_space<vmem>>, %arg2: memref<41x128xbf16, #tpu.memory_space<vmem>>, %arg3: memref<1x128xf32, #tpu.memory_space<vmem>>, %arg4: memref<32x128xf32, #tpu.memory_space<vmem>>) attributes {dimension_semantics = [#tpu.dimension_semantics<parallel>], iteration_bounds = array<i64: 1>, scalar_prefetch = 0 : i64, scratch_operands = 0 : i64, tpu.core_type = #tpu.core_type<tc>, window_params = [{transform_indices = @transform_0, window_bounds = array<i64: 32, 41>}, {pipeline_mode = #tpu.pipeline_mode<synchronous>, transform_indices = @transform_1, window_bounds = array<i64: 41, 128>}, {pipeline_mode = #tpu.pipeline_mode<synchronous>, transform_indices = @transform_2, window_bounds = array<i64: 1, 128>}, {transform_indices = @transform_3, window_bounds = array<i64: 32, 128>}]} {
    %c0 = arith.constant 0 : index
    %c0_0 = arith.constant 0 : index
    %0 = vector.load %arg1[%c0, %c0_0] : memref<32x41xf32, #tpu.memory_space<vmem>>, vector<32x41xf32>
    %1 = arith.truncf %0 : vector<32x41xf32> to vector<32x41xbf16>
    %c0_1 = arith.constant 0 : index
    %c0_2 = arith.constant 0 : index
    %2 = vector.load %arg2[%c0_1, %c0_2] : memref<41x128xbf16, #tpu.memory_space<vmem>>, vector<41x128xbf16>
    %cst = arith.constant dense<0.000000e+00> : vector<32x128xf32>
    %3 = tpu.matmul %1, %2, %cst {dimension_numbers = #tpu.dot_dimension_numbers<[1], [0], [0], [1], [0, 0, 1, 1], [], []>} : vector<32x41xbf16>, vector<41x128xbf16>, vector<32x128xf32> -> vector<32x128xf32>
    %c0_3 = arith.constant 0 : index
    %c0_4 = arith.constant 0 : index
    %4 = vector.load %arg3[%c0_3, %c0_4] : memref<1x128xf32, #tpu.memory_space<vmem>>, vector<1x128xf32>
    %5 = vector.broadcast %4 : vector<1x128xf32> to vector<32x128xf32>
    %6 = arith.addf %3, %5 : vector<32x128xf32>
    %c0_5 = arith.constant 0 : index
    %c0_6 = arith.constant 0 : index
    %7 = vector.load %arg4[%c0_5, %c0_6] : memref<32x128xf32, #tpu.memory_space<vmem>>, vector<32x128xf32>
    tpu.vector_store %arg4[%c0_5, %c0_6], %6 {strides = array<i32>} : memref<32x128xf32, #tpu.memory_space<vmem>>, vector<32x128xf32>,
    return
  }
  func.func @transform_0(%arg0: i32) -> (i32, i32) {
    %c0_i32 = arith.constant 0 : i32
    %c0_i32_0 = arith.constant 0 : i32
    return %arg0, %c0_i32 : i32, i32
  }
  func.func @transform_1(%arg0: i32) -> (i32, i32) {
    %c0_i32 = arith.constant 0 : i32
    %c0_i32_0 = arith.constant 0 : i32
    %c0_i32_1 = arith.constant 0 : i32
    return %c0_i32, %c0_i32_0 : i32, i32
  }
  func.func @transform_2(%arg0: i32) -> (i32, i32) {
    %c0_i32 = arith.constant 0 : i32
    %c0_i32_0 = arith.constant 0 : i32
    %c0_i32_1 = arith.constant 0 : i32
    return %c0_i32, %c0_i32_0 : i32, i32
  }
  func.func @transform_3(%arg0: i32) -> (i32, i32) {
    %c0_i32 = arith.constant 0 : i32
    %c0_i32_0 = arith.constant 0 : i32
    return %arg0, %c0_i32 : i32, i32
  }
}

</mosaic_0001>

<bundles_post_ra>
// kernel: tpu_custom_call.1
= control target key start
LH: loop header
LB: loop body
LE: loop exit
PB: predicated region body
PF: predicated region fallthrough
CT: control target
= control target key end

     0   :  { %8 = vsyncpa [#allocation3], 0  ;;  %s309_s0 = inlined_call_operand.hbm [shape: f32[32,41], index: 0, kind: input, shape index: {}]   ;;  %s310_s1 = inlined_call_operand.hbm [shape: bf16[41,128], index: 1, kind: input, shape index: {}]   ;;  %s311_s2 = inlined_call_operand.vmem [shape: f32[1,128], index: 2, kind: input, shape index: {}]   ;;  %s312_s3 = inlined_call_operand.hbm [shape: f32[32,128], index: 3, kind: output, shape index: {}]  }
   0x1   :  { %9 = vsyncpa [#allocation6], 0 }
   0x2   :  { %10 = vsyncpa [#allocation4], 0  ;;  %s263_s12 = smov [#allocation2]  }
   0x3   :  { %s16_s13 = sshll.u32 %s263_s12, 4  ;;  %s17_s13 = int_to_ptr.vmem [resolvable:$true] %s16_s13 }
   0x4   :  { %s205_s14 = scalar_lea.vmem %s17_s13, 512  ;;  %p210_p1 = scmp.lt.s32.totalorder %s17_s13, %s17_s13 }
   0x5   :  { %p206_p0 = scmp.ne.s32.totalorder %s17_s13, %s205_s14  ;;  %p211_p2 = scmp.lt.s32.totalorder %s205_s14, %s205_s14 }
   0x7   :  { %p212_p3 = por %p211_p2, %p210_p1 }
   0x9   :  { %p213_p4 = pnand %p212_p3, %p206_p0 }
   0xb   :  { %216 = shalt.err (!%p213_p4)
}
   0xc   :  { %s264_s15 = smov 128   ;;  %s265_s16 = smov 8  }
   0xd   :  { %22 = dma.hbm_to_vmem [thread:$0]  %s309_s0, 512, %s17_s13, [#allocation3], %s264_s15, %s264_s15, %s265_s16  }
   0xe   :  { %s266_s19 = smov [#allocation5]  }
   0xf   :  { %s28_s20 = sshll.u32 %s266_s19, 4  ;;  %s29_s20 = int_to_ptr.vmem [resolvable:$true] %s28_s20 }
  0x10   :  { %s225_s21 = scalar_lea.vmem %s29_s20, 384  ;;  %p230_p6 = scmp.lt.s32.totalorder %s29_s20, %s29_s20 }
  0x11   :  { %p226_p5 = scmp.ne.s32.totalorder %s29_s20, %s225_s21  ;;  %p231_p7 = scmp.lt.s32.totalorder %s225_s21, %s225_s21 }
  0x13   :  { %p232_p8 = por %p231_p7, %p230_p6 }
  0x15   :  { %p233_p9 = pnand %p232_p8, %p226_p5 }
  0x17   :  { %236 = shalt.err (!%p233_p9)
}
  0x18   :  { %s267_s22 = smov 64   ;;  %s268_s23 = smov 4  }
  0x19   :  { %34 = dma.hbm_to_vmem [thread:$0]  %s310_s1, 384, %s29_s20, [#allocation6], %s267_s22, %s267_s22, %s268_s23  }
  0x1a   :  { %257 = dma.done.wait [#allocation3], 512  }
  0x1b   :  { %258 = vsyncadd [#allocation3], 4294966784 }
  0x1c   :  { %259 = dma.done.wait [#allocation6], 384  }
  0x1d   :  { %260 = vsyncadd [#allocation6], 4294966912  ;;  %vm87_vm0 = vcmask 1043456   ;;  %vm88_vm1 = vcmask 1044480   ;;  %v269_v0 = vmov 65535   ;;  %v195_v5 = vld [vmem:[#allocation5 + $0x8] sm:$0xff]  }
  0x1e   :  { %v89_v1 = vsel %vm87_vm0, 4294967295, %v269_v0  ;;  %v194_v3 = vld [vmem:[#allocation5 + $0x10] sm:$0x1f]   ;;  %v44_v6 = vld [vmem:[#allocation2] sm:$0xff]  ;;  %v45_v7 = vld [vmem:[#allocation2 + $0x8] sm:$0xff]  ;;  %vm80_vm2 = vcmask 334848  }
  0x1f   :  { %v90_v2 = vsel %vm88_vm1, %v89_v1, 0  ;;  %v48_v8 = vpack.c.bf16 %v45_v7, %v44_v6  ;;  %v196_v9 = vld [vmem:[#allocation5] sm:$0xff]   ;;  %v46_v10 = vld [vmem:[#allocation2 + $0x10] sm:$0xff]  ;;  %v47_v11 = vld [vmem:[#allocation2 + $0x18] sm:$0xff]  ;;  %s270_s26 = smov [#allocation7]  }
  0x20   :  { %v92_v4 = vand.u32 %v194_v3, %v90_v2  ;;  %v49_v12 = vpack.c.bf16 %v47_v11, %v46_v10  ;;  %v165_v13 = vld [vmem:[%s311_s2] ss:$0 sm:$0xff]  ;;  %s152_s27 = sshll.u32 %s270_s26, 4  ;;  %s153_s27 = int_to_ptr.vmem [resolvable:$true] %s152_s27 }
  0x21   :  { %182 = vmatprep.mubr.msk.bf16.mxu0 %vm80_vm2, %v48_v8  ;;  %s237_s28 = scalar_lea.vmem %s153_s27, 512  ;;  %p242_p11 = scmp.lt.s32.totalorder %s153_s27, %s153_s27 }
  0x22   :  { %176 = vmatprep.subr.bf16.mxu0 %v92_v4  ;;  %p238_p10 = scmp.ne.s32.totalorder %s153_s27, %s237_s28  ;;  %p243_p12 = scmp.lt.s32.totalorder %s237_s28, %s237_s28 }
  0x23   :  { %177 = vmatpush3.bf16.msra.mxu0 %v92_v4 }
  0x24   :  { %178 = vmatprep.subr.bf16.mxu0 %v195_v5  ;;  %p244_p13 = por %p243_p12, %p242_p11 }
  0x26   :  { %p245_p0 = pnand %p244_p13, %p238_p10 }
  0x27   :  { %179 = vmatpush3.bf16.msra.mxu0 %v195_v5 }
  0x28   :  { %180 = vmatprep.subr.bf16.mxu0 %v196_v9 }
  0x2b   :  { %181 = vmatpush3.bf16.msra.mxu0 %v196_v9 }
  0x2e   :  { %183 = vmatmul.mubr.msk.bf16.vlgmr.msra.gmra.mxu0 %vm80_vm2, %v49_v12 }
  0xee   :  { %v184_v14 = vpop.f32.mrf.mxu0 }
  0xef   :  { %v137_v15 = vadd.f32 %v184_v14, %v165_v13 }
  0xf0   :  { %v128_v16 = vpop.f32.mrf.mxu0 }
  0xf1   :  { %145 = vst [vmem:[#allocation7 + $0x10] sm:$0xff] %v137_v15  ;;  %v129_v17 = vadd.f32 %v165_v13, %v128_v16 }
  0xf2   :  { %v185_v18 = vpop.f32.mrf.mxu0 }
  0xf3   :  { %143 = vst [vmem:[#allocation7] sm:$0xff] %v129_v17  ;;  %v140_v19 = vadd.f32 %v185_v18, %v165_v13 }
  0xf4   :  { %v131_v20 = vpop.f32.mrf.mxu0 }
  0xf5   :  { %146 = vst [vmem:[#allocation7 + $0x18] sm:$0xff] %v140_v19  ;;  %v132_v21 = vadd.f32 %v165_v13, %v131_v20 }
  0xf7   :  { %144 = vst [vmem:[#allocation7 + $0x8] sm:$0xff] %v132_v21 }
  0xf8   :  { %248 = shalt.err (!%p245_p0)
}
  0xf9   :  { %158 = dma.vmem_to_hbm [thread:$0]  %s153_s27, 512, %s312_s3, [#allocation4], %s264_s15, %s264_s15, %s265_s16  }
  0xfa   :  { %261 = dma.done.wait [#allocation4], 512  }
  0xfb   :  { %262 = vsyncadd [#allocation4], 4294966784 }
  0xfc   :  { %162 = vsyncpa [#allocation3], 1 }
  0xfd   :  { %163 = vsyncpa [#allocation6], 1 }
  0xfe   :  { %164 = vsyncpa [#allocation4], 1 }

</bundles_post_ra>
